<compile_context>
chip_gen: v7x
topology: tpu7x:2x2x1
jax: 0.10.0
libtpu: 0.0.40
codegen_flags: <defaults>
</compile_context>

<pallas_src>
import math

import jax
import jax.numpy as jnp
from jax.experimental import pallas as pl
from jax.experimental.pallas import tpu as pltpu

LOG_STD_MAX = 2.0
LOG_STD_MIN = -5.0
_LS_SCALE = 0.5 * (LOG_STD_MAX - LOG_STD_MIN)   # 3.5
_LS_SHIFT = LOG_STD_MIN + _LS_SCALE             # -1.5
# sanity: LOG_STD_MIN + 0.5*(MAX-MIN)*(t+1) == _LS_SCALE*t + _LS_SHIFT

# BipedalWalker-v3: observation (24,), action (4,)
N_OBS = 24
N_ACT = 4
HIDDEN = 256
HEAD = 2 * N_ACT      # logical fused [mean | log_std] head width
HEAD_PAD = 128        # lane-dense padded head width

# bf16 weight bytes (w1, b1, w2, b2, wh, bh) for the cost estimate
_WEIGHT_BYTES = (N_OBS * HIDDEN * 2 + HIDDEN * 4
                 + HIDDEN * HIDDEN * 2 + HIDDEN * 4
                 + HIDDEN * HEAD_PAD * 2 + HEAD_PAD * 4)


def _actor_kernel(x_ref, w1_ref, b1_ref, w2_ref, b2_ref, wh_ref, bh_ref, out_ref):
    # fc1 + relu  (bf16 MXU inputs, f32 accumulate, f32 elementwise)
    h1 = jnp.dot(x_ref[...], w1_ref[...],
                 preferred_element_type=jnp.float32) + b1_ref[...]
    h1 = jnp.maximum(h1, 0.0)

    # fc2 + relu  (dominant matmul)
    h2 = jnp.dot(h1.astype(jnp.bfloat16), w2_ref[...],
                 preferred_element_type=jnp.float32) + b2_ref[...]
    h2 = jnp.maximum(h2, 0.0)

    # fused, lane-padded head: cols [0:N_ACT]=mean, [N_ACT:2*N_ACT]=log_std pre-squash,
    # remaining cols are zero-padding (sliced off in the wrapper).
    head = jnp.dot(h2.astype(jnp.bfloat16), wh_ref[...],
                   preferred_element_type=jnp.float32) + bh_ref[...]

    # tanh goes to the EUP slot (essentially free); select which columns get squashed.
    squashed = _LS_SCALE * jnp.tanh(head) + _LS_SHIFT
    col = jax.lax.broadcasted_iota(jnp.int32, head.shape, 1)
    out_ref[...] = jnp.where(col < N_ACT, head, squashed)


def pack_actor_params(params):
    """One-time packing: fuse the two heads, zero-pad to 128 lanes, cast weights to bf16."""
    w1, b1, w2, b2, wm, bm, ws, bs = params
    wh = jnp.concatenate([wm, ws], axis=1)               # (HIDDEN, 2*N_ACT)
    bh = jnp.concatenate([bm, bs], axis=1)               # (1, 2*N_ACT)
    wh = jnp.pad(wh, ((0, 0), (0, HEAD_PAD - HEAD)))     # zero-pad lanes
    bh = jnp.pad(bh, ((0, 0), (0, HEAD_PAD - HEAD)))     # padded bias cols MUST be zero
    return (w1.astype(jnp.bfloat16), b1.astype(jnp.float32),
            w2.astype(jnp.bfloat16), b2.astype(jnp.float32),
            wh.astype(jnp.bfloat16), bh.astype(jnp.float32))


def _round_up(x, m):
    return ((x + m - 1) // m) * m


_TB_CANDIDATES = (1024, 512, 256, 128, 64, 32, 16)


def _select_tile(batch):
    """Pick (tb, b_pad): largest tile with <=25% padding waste, >=2 grid steps when possible."""
    b16 = _round_up(batch, 16)          # bf16 sublane granularity
    cap = 1024
    if b16 >= 32:
        # guarantee at least 2 grid steps so v7x's two TensorCores both get work
        cap = min(cap, _round_up(-(-b16 // 2), 16))
    for tb in _TB_CANDIDATES:
        if tb > cap:
            continue
        b_pad = _round_up(batch, tb)
        waste = b_pad - batch
        if 4 * waste <= b_pad:          # <= 25% padded/wasted rows
            return tb, b_pad
    return 16, b16                      # tiny-batch fallback (single step)


def actor_forward(x, packed):
    """Pallas-backed Actor.forward. Returns (mean, log_std), each (B, N_ACT) f32."""
    # x.view(x.shape[0], -1)
    x = x.reshape(x.shape[0], -1).astype(jnp.float32)
    batch = x.shape[0]

    tb, b_pad = _select_tile(batch)
    if b_pad != batch:
        x = jnp.pad(x, ((0, b_pad - batch), (0, 0)))
    x = x.astype(jnp.bfloat16)          # wrapper-side cast: halves the streamed input DMA

    w1, b1, w2, b2, wh, bh = packed

    const = lambda i: (0, 0)  # weights/biases: same block every step -> DMA'd once, stay resident
    cost = pl.CostEstimate(
        flops=2 * b_pad * (N_OBS * HIDDEN + HIDDEN * HIDDEN + HIDDEN * HEAD_PAD),
        transcendentals=b_pad * HEAD_PAD,
        bytes_accessed=b_pad * N_OBS * 2 + b_pad * HEAD_PAD * 4 + _WEIGHT_BYTES,
    )

    out = pl.pallas_call(
        _actor_kernel,
        out_shape=jax.ShapeDtypeStruct((b_pad, HEAD_PAD), jnp.float32),
        grid=(b_pad // tb,),
        in_specs=[
            pl.BlockSpec((tb, N_OBS), lambda i: (i, 0)),
            pl.BlockSpec((N_OBS, HIDDEN), const),
            pl.BlockSpec((1, HIDDEN), const),
            pl.BlockSpec((HIDDEN, HIDDEN), const),
            pl.BlockSpec((1, HIDDEN), const),
            pl.BlockSpec((HIDDEN, HEAD_PAD), const),
            pl.BlockSpec((1, HEAD_PAD), const),
        ],
        out_specs=pl.BlockSpec((tb, HEAD_PAD), lambda i: (i, 0)),
        compiler_params=pltpu.CompilerParams(
            dimension_semantics=("parallel",)),
        cost_estimate=cost,
    )(x, w1, b1, w2, b2, wh, bh)

    mean = out[:batch, :N_ACT]
    log_std = out[:batch, N_ACT:HEAD]
    return mean, log_std


def init_actor_params(key):
    """Deterministic init matching nn.Linear's default U(-1/sqrt(fan_in), 1/sqrt(fan_in))."""
    def linear(key, fan_in, fan_out):
        kw, kb = jax.random.split(key)
        bound = 1.0 / math.sqrt(fan_in)
        # stored transposed vs. PyTorch: (in, out)
        w = jax.random.uniform(kw, (fan_in, fan_out), jnp.float32, -bound, bound)
        b = jax.random.uniform(kb, (1, fan_out), jnp.float32, -bound, bound)
        return w, b

    k1, k2, k3, k4 = jax.random.split(key, 4)
    w1, b1 = linear(k1, N_OBS, HIDDEN)
    w2, b2 = linear(k2, HIDDEN, HIDDEN)
    wm, bm = linear(k3, HIDDEN, N_ACT)
    ws, bs = linear(k4, HIDDEN, N_ACT)
    return (w1, b1, w2, b2, wm, bm, ws, bs)


def actor_forward_ref(x, params):
    """Pure-JAX f32 reference for correctness check."""
    x = x.reshape(x.shape[0], -1).astype(jnp.float32)
    w1, b1, w2, b2, wm, bm, ws, bs = params
    h1 = jnp.maximum(x @ w1 + b1, 0.0)
    h2 = jnp.maximum(h1 @ w2 + b2, 0.0)
    mean = h2 @ wm + bm
    log_std = jnp.tanh(h2 @ ws + bs)
    log_std = LOG_STD_MIN + 0.5 * (LOG_STD_MAX - LOG_STD_MIN) * (log_std + 1.0)
    return mean, log_std


if __name__ == "__main__":
    key = jax.random.PRNGKey(0)
    k_params, k_obs = jax.random.split(key)

    params = init_actor_params(k_params)
    packed = pack_actor_params(params)

    # small per-env-step batch
    batch = 2
    x = jax.random.normal(k_obs, (batch, N_OBS), jnp.float32)

    mean, log_std = actor_forward(x, packed)
    jax.block_until_ready((mean, log_std))

    mean_ref, log_std_ref = actor_forward_ref(x, params)
    assert mean.shape == (batch, N_ACT) and log_std.shape == (batch, N_ACT)
    # bf16 MXU inputs (f32 accumulation) -> loosened tolerance vs. the f32 reference.
    assert jnp.allclose(mean, mean_ref, atol=2e-2, rtol=2e-2)
    assert jnp.allclose(log_std, log_std_ref, atol=2e-2, rtol=2e-2)

    # padded / multi-tile batch path (tile selection gives >=2 grid steps here)
    xb = jax.random.normal(k_obs, (37, N_OBS), jnp.float32)
    mb, lb = actor_forward(xb, packed)
    mb_r, lb_r = actor_forward_ref(xb, params)
    jax.block_until_ready((mb, lb))
    assert mb.shape == (37, N_ACT) and lb.shape == (37, N_ACT)
    assert jnp.allclose(mb, mb_r, atol=2e-2, rtol=2e-2)
    assert jnp.allclose(lb, lb_r, atol=2e-2, rtol=2e-2)

    # larger batch exercising the 256-row tiles / dual-core split
    xc = jax.random.normal(k_obs, (300, N_OBS), jnp.float32)
    mc, lc = actor_forward(xc, packed)
    mc_r, lc_r = actor_forward_ref(xc, params)
    jax.block_until_ready((mc, lc))
    assert mc.shape == (300, N_ACT) and lc.shape == (300, N_ACT)
    assert jnp.allclose(mc, mc_r, atol=2e-2, rtol=2e-2)
    assert jnp.allclose(lc, lc_r, atol=2e-2, rtol=2e-2)

    print("KERNEL_OK")
</pallas_src>

<mosaic_0001>
module attributes {stable_mosaic.version = 11 : i64} {
  func.func @_actor_kernel(%arg0: i32, %arg1: memref<16x24xbf16, #tpu.memory_space<vmem>>, %arg2: memref<24x256xbf16, #tpu.memory_space<vmem>>, %arg3: memref<1x256xf32, #tpu.memory_space<vmem>>, %arg4: memref<256x256xbf16, #tpu.memory_space<vmem>>, %arg5: memref<1x256xf32, #tpu.memory_space<vmem>>, %arg6: memref<256x128xbf16, #tpu.memory_space<vmem>>, %arg7: memref<1x128xf32, #tpu.memory_space<vmem>>, %arg8: memref<16x128xf32, #tpu.memory_space<vmem>>) attributes {dimension_semantics = [#tpu.dimension_semantics<parallel>], iteration_bounds = array<i64: 1>, scalar_prefetch = 0 : i64, scratch_operands = 0 : i64, tpu.core_type = #tpu.core_type<tc>, window_params = [{transform_indices = @transform_0, window_bounds = array<i64: 16, 24>}, {pipeline_mode = #tpu.pipeline_mode<synchronous>, transform_indices = @transform_1, window_bounds = array<i64: 24, 256>}, {pipeline_mode = #tpu.pipeline_mode<synchronous>, transform_indices = @transform_2, window_bounds = array<i64: 1, 256>}, {pipeline_mode = #tpu.pipeline_mode<synchronous>, transform_indices = @transform_3, window_bounds = array<i64: 256, 256>}, {pipeline_mode = #tpu.pipeline_mode<synchronous>, transform_indices = @transform_4, window_bounds = array<i64: 1, 256>}, {pipeline_mode = #tpu.pipeline_mode<synchronous>, transform_indices = @transform_5, window_bounds = array<i64: 256, 128>}, {pipeline_mode = #tpu.pipeline_mode<synchronous>, transform_indices = @transform_6, window_bounds = array<i64: 1, 128>}, {transform_indices = @transform_7, window_bounds = array<i64: 16, 128>}]} {
    %c0 = arith.constant 0 : index
    %c0_0 = arith.constant 0 : index
    %0 = vector.load %arg1[%c0, %c0_0] : memref<16x24xbf16, #tpu.memory_space<vmem>>, vector<16x24xbf16>
    %c0_1 = arith.constant 0 : index
    %c0_2 = arith.constant 0 : index
    %1 = vector.load %arg2[%c0_1, %c0_2] : memref<24x256xbf16, #tpu.memory_space<vmem>>, vector<24x256xbf16>
    %cst = arith.constant dense<0.000000e+00> : vector<16x256xf32>
    %2 = tpu.matmul %0, %1, %cst {dimension_numbers = #tpu.dot_dimension_numbers<[1], [0], [0], [1], [0, 0, 1, 1], [], []>} : vector<16x24xbf16>, vector<24x256xbf16>, vector<16x256xf32> -> vector<16x256xf32>
    %c0_3 = arith.constant 0 : index
    %c0_4 = arith.constant 0 : index
    %3 = vector.load %arg3[%c0_3, %c0_4] : memref<1x256xf32, #tpu.memory_space<vmem>>, vector<1x256xf32>
    %4 = vector.broadcast %3 : vector<1x256xf32> to vector<16x256xf32>
    %5 = arith.addf %2, %4 : vector<16x256xf32>
    %cst_5 = arith.constant 0.000000e+00 : f32
    %6 = vector.broadcast %cst_5 : f32 to vector<16x256xf32>
    %7 = arith.maximumf %5, %6 : vector<16x256xf32>
    %8 = arith.truncf %7 : vector<16x256xf32> to vector<16x256xbf16>
    %c0_6 = arith.constant 0 : index
    %c0_7 = arith.constant 0 : index
    %9 = vector.load %arg4[%c0_6, %c0_7] : memref<256x256xbf16, #tpu.memory_space<vmem>>, vector<256x256xbf16>
    %cst_8 = arith.constant dense<0.000000e+00> : vector<16x256xf32>
    %10 = tpu.matmul %8, %9, %cst_8 {dimension_numbers = #tpu.dot_dimension_numbers<[1], [0], [0], [1], [0, 0, 1, 1], [], []>} : vector<16x256xbf16>, vector<256x256xbf16>, vector<16x256xf32> -> vector<16x256xf32>
    %c0_9 = arith.constant 0 : index
    %c0_10 = arith.constant 0 : index
    %11 = vector.load %arg5[%c0_9, %c0_10] : memref<1x256xf32, #tpu.memory_space<vmem>>, vector<1x256xf32>
    %12 = vector.broadcast %11 : vector<1x256xf32> to vector<16x256xf32>
    %13 = arith.addf %10, %12 : vector<16x256xf32>
    %cst_11 = arith.constant 0.000000e+00 : f32
    %14 = vector.broadcast %cst_11 : f32 to vector<16x256xf32>
    %15 = arith.maximumf %13, %14 : vector<16x256xf32>
    %16 = arith.truncf %15 : vector<16x256xf32> to vector<16x256xbf16>
    %c0_12 = arith.constant 0 : index
    %c0_13 = arith.constant 0 : index
    %17 = vector.load %arg6[%c0_12, %c0_13] : memref<256x128xbf16, #tpu.memory_space<vmem>>, vector<256x128xbf16>
    %cst_14 = arith.constant dense<0.000000e+00> : vector<16x128xf32>
    %18 = tpu.matmul %16, %17, %cst_14 {dimension_numbers = #tpu.dot_dimension_numbers<[1], [0], [0], [1], [0, 0, 1, 1], [], []>} : vector<16x256xbf16>, vector<256x128xbf16>, vector<16x128xf32> -> vector<16x128xf32>
    %c0_15 = arith.constant 0 : index
    %c0_16 = arith.constant 0 : index
    %19 = vector.load %arg7[%c0_15, %c0_16] : memref<1x128xf32, #tpu.memory_space<vmem>>, vector<1x128xf32>
    %20 = vector.broadcast %19 : vector<1x128xf32> to vector<16x128xf32>
    %21 = arith.addf %18, %20 : vector<16x128xf32>
    %22 = math.tanh %21 : vector<16x128xf32>
    %cst_17 = arith.constant 3.500000e+00 : f32
    %23 = vector.broadcast %cst_17 : f32 to vector<16x128xf32>
    %24 = arith.mulf %23, %22 : vector<16x128xf32>
    %cst_18 = arith.constant -1.500000e+00 : f32
    %25 = vector.broadcast %cst_18 : f32 to vector<16x128xf32>
    %26 = arith.addf %24, %25 : vector<16x128xf32>
    %27 = tpu.iota {dimensions = array<i32: 1>} : vector<16x128xi32>
    %c4_i32 = arith.constant 4 : i32
    %28 = vector.broadcast %c4_i32 : i32 to vector<16x128xi32>
    %29 = arith.cmpi slt, %27, %28 : vector<16x128xi32>
    %30 = arith.select %29, %21, %26 : vector<16x128xi1>, vector<16x128xf32>
    %c0_19 = arith.constant 0 : index
    %c0_20 = arith.constant 0 : index
    %31 = vector.load %arg8[%c0_19, %c0_20] : memref<16x128xf32, #tpu.memory_space<vmem>>, vector<16x128xf32>
    tpu.vector_store %arg8[%c0_19, %c0_20], %30 {strides = array<i32>} : memref<16x128xf32, #tpu.memory_space<vmem>>, vector<16x128xf32>,
    return
  }
  func.func @transform_0(%arg0: i32) -> (i32, i32) {
    %c0_i32 = arith.constant 0 : i32
    %c0_i32_0 = arith.constant 0 : i32
    return %arg0, %c0_i32 : i32, i32
  }
  func.func @transform_1(%arg0: i32) -> (i32, i32) {
    %c0_i32 = arith.constant 0 : i32
    %c0_i32_0 = arith.constant 0 : i32
    %c0_i32_1 = arith.constant 0 : i32
    return %c0_i32, %c0_i32_0 : i32, i32
  }
  func.func @transform_2(%arg0: i32) -> (i32, i32) {
    %c0_i32 = arith.constant 0 : i32
    %c0_i32_0 = arith.constant 0 : i32
    %c0_i32_1 = arith.constant 0 : i32
    return %c0_i32, %c0_i32_0 : i32, i32
  }
  func.func @transform_3(%arg0: i32) -> (i32, i32) {
    %c0_i32 = arith.constant 0 : i32
    %c0_i32_0 = arith.constant 0 : i32
    %c0_i32_1 = arith.constant 0 : i32
    return %c0_i32, %c0_i32_0 : i32, i32
  }
  func.func @transform_4(%arg0: i32) -> (i32, i32) {
    %c0_i32 = arith.constant 0 : i32
    %c0_i32_0 = arith.constant 0 : i32
    %c0_i32_1 = arith.constant 0 : i32
    return %c0_i32, %c0_i32_0 : i32, i32
  }
  func.func @transform_5(%arg0: i32) -> (i32, i32) {
    %c0_i32 = arith.constant 0 : i32
    %c0_i32_0 = arith.constant 0 : i32
    %c0_i32_1 = arith.constant 0 : i32
    return %c0_i32, %c0_i32_0 : i32, i32
  }
  func.func @transform_6(%arg0: i32) -> (i32, i32) {
    %c0_i32 = arith.constant 0 : i32
    %c0_i32_0 = arith.constant 0 : i32
    %c0_i32_1 = arith.constant 0 : i32
    return %c0_i32, %c0_i32_0 : i32, i32
  }
  func.func @transform_7(%arg0: i32) -> (i32, i32) {
    %c0_i32 = arith.constant 0 : i32
    %c0_i32_0 = arith.constant 0 : i32
    return %arg0, %c0_i32 : i32, i32
  }
}

</mosaic_0001>

<bundles_post_ra>
// kernel: tpu_custom_call.1
= control target key start
LH: loop header
LB: loop body
LE: loop exit
PB: predicated region body
PF: predicated region fallthrough
CT: control target
= control target key end

     0   :  { %12 = vsyncpa [#allocation3], 0  ;;  %s1062_s0 = inlined_call_operand.hbm [shape: bf16[16,24], index: 0, kind: input, shape index: {}]   ;;  %s1063_s1 = inlined_call_operand.hbm [shape: bf16[24,256], index: 1, kind: input, shape index: {}]   ;;  %s1064_s2 = inlined_call_operand.vmem [shape: f32[1,256], index: 2, kind: input, shape index: {}]   ;;  %s1065_s3 = inlined_call_operand.hbm [shape: bf16[256,256], index: 3, kind: input, shape index: {}]   ;;  %s1066_s4 = inlined_call_operand.vmem [shape: f32[1,256], index: 4, kind: input, shape index: {}]   ;;  %s1067_s5 = inlined_call_operand.hbm [shape: bf16[256,128], index: 5, kind: input, shape index: {}]   ;;  %s1068_s6 = inlined_call_operand.vmem [shape: f32[1,128], index: 6, kind: input, shape index: {}]   ;;  %s1069_s7 = inlined_call_operand.hbm [shape: f32[16,128], index: 7, kind: output, shape index: {}]  }
   0x1   :  { %13 = vsyncpa [#allocation6], 0 }
   0x2   :  { %14 = vsyncpa [#allocation9], 0 }
   0x3   :  { %15 = vsyncpa [#allocation4], 0  ;;  %s921_s24 = smov [#allocation5]   ;;  %s803_s28 = scalar_lea.hbm %s1063_s1, 384 }
   0x4   :  { %s33_s25 = sshll.u32 %s921_s24, 4  ;;  %p804_p0 = scmp.ne.s32.totalorder %s1063_s1, %s803_s28  ;;  %s34_s25 = int_to_ptr.vmem [resolvable:$true] %s33_s25 }
   0x5   :  { %p807_p1 = scmp.lt.u32.totalorder %s803_s28, %s1063_s1 }
   0x7   :  { %p809_p2 = pnand %p807_p1, %p804_p0 }
   0x9   :  { %812 = shalt.err (!%p809_p2)
}
   0xa   :  { %s813_s10 = scalar_lea.vmem %s34_s25, 384  ;;  %p818_p4 = scmp.lt.s32.totalorder %s34_s25, %s34_s25 }
   0xb   :  { %p814_p3 = scmp.ne.s32.totalorder %s34_s25, %s813_s10  ;;  %p819_p5 = scmp.lt.s32.totalorder %s813_s10, %s813_s10 }
   0xd   :  { %p820_p6 = por %p819_p5, %p818_p4 }
   0xf   :  { %p821_p7 = pnand %p820_p6, %p814_p3 }
  0x11   :  { %824 = shalt.err (!%p821_p7)
}
  0x12   :  { %s922_s11 = smov 128   ;;  %s923_s12 = smov 8  }
  0x13   :  { %39 = dma.hbm_to_vmem [thread:$0]  %s1063_s1, 384, %s34_s25, [#allocation6], %s922_s11, %s922_s11, %s923_s12  }
  0x14   :  { %s924_s15 = smov [#allocation2]   ;;  %s825_s19 = scalar_lea.hbm %s1062_s0, 128 }
  0x15   :  { %s21_s16 = sshll.u32 %s924_s15, 4  ;;  %p826_p8 = scmp.ne.s32.totalorder %s1062_s0, %s825_s19  ;;  %s22_s16 = int_to_ptr.vmem [resolvable:$true] %s21_s16 }
  0x16   :  { %p829_p9 = scmp.lt.u32.totalorder %s825_s19, %s1062_s0 }
  0x18   :  { %p831_p10 = pnand %p829_p9, %p826_p8 }
  0x1a   :  { %834 = shalt.err (!%p831_p10)
}
  0x1b   :  { %s835_s24 = scalar_lea.vmem %s22_s16, 128  ;;  %p840_p12 = scmp.lt.s32.totalorder %s22_s16, %s22_s16 }
  0x1c   :  { %p836_p11 = scmp.ne.s32.totalorder %s22_s16, %s835_s24  ;;  %p841_p13 = scmp.lt.s32.totalorder %s835_s24, %s835_s24 }
  0x1e   :  { %p842_p0 = por %p841_p13, %p840_p12 }
  0x20   :  { %p843_p1 = pnand %p842_p0, %p836_p11 }
  0x22   :  { %846 = shalt.err (!%p843_p1)
}
  0x23   :  { %s925_s1 = smov 64   ;;  %s926_s25 = smov 4  }
  0x24   :  { %27 = dma.hbm_to_vmem [thread:$0]  %s1062_s0, 128, %s22_s16, [#allocation3], %s925_s1, %s925_s1, %s926_s25  }
  0x25   :  { %s927_s28 = smov [#allocation7]   ;;  %s928_s30 = smov [#allocation8]  }
  0x26   :  { %s47_s29 = sshll.u32 %s927_s28, 4  ;;  %s61_s8 = sshll.u32 %s928_s30, 4  ;;  %s48_s29 = int_to_ptr.vmem [resolvable:$true] %s47_s29  ;;  %s1001_s8 = int_to_ptr.vmem [resolvable:$true] %s61_s8 }
  0x27   :  { %s847_s13 = scalar_lea.hbm %s1065_s3, 4096 }
  0x28   :  { %p848_p2 = scmp.ne.s32.totalorder %s1065_s3, %s847_s13  ;;  %p851_p3 = scmp.lt.u32.totalorder %s847_s13, %s1065_s3 }
  0x2a   :  { %p853_p4 = pnand %p851_p3, %p848_p2 }
  0x2c   :  { %856 = shalt.err (!%p853_p4)
}
  0x2d   :  { %s857_s0 = scalar_lea.vmem %s48_s29, 4096  ;;  %p862_p6 = scmp.lt.s32.totalorder %s48_s29, %s48_s29 }
  0x2e   :  { %p858_p5 = scmp.ne.s32.totalorder %s48_s29, %s857_s0  ;;  %p863_p7 = scmp.lt.s32.totalorder %s857_s0, %s857_s0 }
  0x30   :  { %p864_p8 = por %p863_p7, %p862_p6 }
  0x32   :  { %p865_p9 = pnand %p864_p8, %p858_p5 }
  0x34   :  { %868 = shalt.err (!%p865_p9)
}
  0x35   :  { %53 = dma.hbm_to_vmem [thread:$0]  %s1065_s3, 4096, %s48_s29, [#allocation6], %s922_s11, %s922_s11, %s923_s12  }
  0x36   :  { %s869_s22 = scalar_lea.hbm %s1067_s5, 2048 }
  0x37   :  { %p870_p10 = scmp.ne.s32.totalorder %s1067_s5, %s869_s22  ;;  %p873_p11 = scmp.lt.u32.totalorder %s869_s22, %s1067_s5 }
  0x39   :  { %p875_p12 = pnand %p873_p11, %p870_p10 }
  0x3b   :  { %878 = shalt.err (!%p875_p12)
}
  0x3c   :  { %s879_s28 = scalar_lea.vmem %s1001_s8, 2048  ;;  %p884_p0 = scmp.lt.s32.totalorder %s1001_s8, %s1001_s8 }
  0x3d   :  { %p880_p13 = scmp.ne.s32.totalorder %s1001_s8, %s879_s28  ;;  %p885_p1 = scmp.lt.s32.totalorder %s879_s28, %s879_s28 }
  0x3f   :  { %p886_p2 = por %p885_p1, %p884_p0 }
  0x41   :  { %p887_p3 = pnand %p886_p2, %p880_p13 }
  0x43   :  { %890 = shalt.err (!%p887_p3)
}
  0x44   :  { %67 = dma.hbm_to_vmem [thread:$0]  %s1067_s5, 2048, %s1001_s8, [#allocation9], %s925_s1, %s925_s1, %s926_s25  }
  0x45   :  { %913 = dma.done.wait [#allocation3], 128  }
  0x46   :  { %914 = vsyncadd [#allocation3], 4294967168 }
  0x47   :  { %915 = dma.done.wait [#allocation6], 4480  }
  0x48   :  { %916 = vsyncadd [#allocation6], 4294962816 }
  0x49   :  { %917 = dma.done.wait [#allocation9], 2048  }
  0x4a   :  { %918 = vsyncadd [#allocation9], 4294965248  ;;  %v929_v0 = vmov 0   ;;  %v729_v1 = vld [vmem:[#allocation5 + $0x4] ss:$8 sps:$4 sm:$0xff]   ;;  %v87_v3 = vld [vmem:[#allocation5 + $0x10] sm:$0xff]  ;;  %v90_v51 = vlaneseq }
  0x4b   :  { %163 = vmatprep.mubr.bf16.mxu0 %v929_v0  ;;  %v731_v2 = vld [vmem:[#allocation5] ss:$8 sps:$4 sm:$0xff]   ;;  %vm124_vm0 = vcmask 1043456   ;;  %131 = vmatprep.subr.bf16.mxu0 %v729_v1  ;;  %v645_v4 = vcombine.high %v87_v3, %v87_v3  ;;  %v644_v5 = vcombine.low %v87_v3, %v87_v3  ;;  %v735_v6 = vld [vmem:[#allocation7 + $0x4] ss:$8 sps:$4 sm:$0xff]   ;;  %vm120_vm1 = vcmask 195584  }
  0x4c   :  { %132 = vmatpush1.bf16.msra.mxu0 %v731_v2  ;;  %v737_v7 = vld [vmem:[#allocation7] ss:$8 sps:$4 sm:$0xff]   ;;  %v738_v9 = vld [vmem:[#allocation7 + $0x14] ss:$8 sps:$4 sm:$0xff]   ;;  %384 = vmatprep.subr.bf16.mxu1 %v735_v6  ;;  %v740_v11 = vld [vmem:[#allocation7 + $0x10] ss:$8 sps:$4 sm:$0xff]  }
  0x4d   :  { %646 = vmatprep.subr.msk.bf16.mxu0 %vm124_vm0, %v645_v4  ;;  %v126_v8 = vsel %vm124_vm0, %v644_v5, 0  ;;  %v734_v10 = vld [vmem:[#allocation2] sm:$0xff]   ;;  %385 = vmatpush1.bf16.msra.mxu1 %v737_v7  ;;  %v744_v14 = vld [vmem:[#allocation7 + $0x34] ss:$8 sps:$4 sm:$0xff]   ;;  %v746_v15 = vld [vmem:[#allocation7 + $0x30] ss:$8 sps:$4 sm:$0xff]  }
  0x4e   :  { %386 = vmatprep.subr.bf16.mxu1 %v738_v9  ;;  %v741_v12 = vld [vmem:[#allocation7 + $0x24] ss:$8 sps:$4 sm:$0xff]   ;;  %v743_v13 = vld [vmem:[#allocation7 + $0x20] ss:$8 sps:$4 sm:$0xff]   ;;  %v750_v18 = vld [vmem:[#allocation7 + $0x54] ss:$8 sps:$4 sm:$0xff]  }
  0x4f   :  { %v747_v16 = vld [vmem:[#allocation7 + $0x44] ss:$8 sps:$4 sm:$0xff]   ;;  %v749_v17 = vld [vmem:[#allocation7 + $0x40] ss:$8 sps:$4 sm:$0xff]   ;;  %v752_v19 = vld [vmem:[#allocation7 + $0x50] ss:$8 sps:$4 sm:$0xff]  }
  0x50   :  { %134 = vmatpush1.bf16.msra.mxu0 %v126_v8  ;;  %v753_v20 = vld [vmem:[#allocation7 + $0x64] ss:$8 sps:$4 sm:$0xff]   ;;  %v755_v21 = vld [vmem:[#allocation7 + $0x60] ss:$8 sps:$4 sm:$0xff]   ;;  %v756_v22 = vld [vmem:[#allocation7 + $0x74] ss:$8 sps:$4 sm:$0xff]  }
  0x51   :  { %387 = vmatpush1.bf16.msra.mxu1 %v740_v11  ;;  %v758_v23 = vld [vmem:[#allocation7 + $0x70] ss:$8 sps:$4 sm:$0xff]   ;;  %v759_v24 = vld [vmem:[#allocation7 + $0x84] ss:$8 sps:$4 sm:$0xff]   ;;  %v761_v25 = vld [vmem:[#allocation7 + $0x80] ss:$8 sps:$4 sm:$0xff]  }
  0x52   :  { %388 = vmatprep.subr.bf16.mxu1 %v741_v12  ;;  %v762_v26 = vld [vmem:[#allocation7 + $0x94] ss:$8 sps:$4 sm:$0xff]   ;;  %v764_v27 = vld [vmem:[#allocation7 + $0x90] ss:$8 sps:$4 sm:$0xff]   ;;  %v765_v28 = vld [vmem:[#allocation7 + $0xa4] ss:$8 sps:$4 sm:$0xff]  }
  0x53   :  { %647 = vmatmul.mubr.msk.bf16.vlgmr.msra.gmra.mrb[0].mxu0 %vm120_vm1, %v734_v10  ;;  %v767_v29 = vld [vmem:[#allocation7 + $0xa0] ss:$8 sps:$4 sm:$0xff]   ;;  %v768_v30 = vld [vmem:[#allocation7 + $0xb4] ss:$8 sps:$4 sm:$0xff]   ;;  %v770_v31 = vld [vmem:[#allocation7 + $0xb0] ss:$8 sps:$4 sm:$0xff]  }
  0x54   :  { %v771_v32 = vld [vmem:[#allocation7 + $0xc4] ss:$8 sps:$4 sm:$0xff]   ;;  %v773_v33 = vld [vmem:[#allocation7 + $0xc0] ss:$8 sps:$4 sm:$0xff]   ;;  %v774_v34 = vld [vmem:[#allocation7 + $0xd4] ss:$8 sps:$4 sm:$0xff]  }
  0x55   :  { %389 = vmatpush1.bf16.msra.mxu1 %v743_v13  ;;  %v776_v35 = vld [vmem:[#allocation7 + $0xd0] ss:$8 sps:$4 sm:$0xff]   ;;  %v777_v36 = vld [vmem:[#allocation7 + $0xe4] ss:$8 sps:$4 sm:$0xff]   ;;  %v779_v37 = vld [vmem:[#allocation7 + $0xe0] ss:$8 sps:$4 sm:$0xff]  }
  0x56   :  { %390 = vmatprep.subr.bf16.mxu1 %v744_v14  ;;  %v780_v38 = vld [vmem:[#allocation7 + $0xf4] ss:$8 sps:$4 sm:$0xff]   ;;  %v782_v39 = vld [vmem:[#allocation7 + $0xf0] ss:$8 sps:$4 sm:$0xff]   ;;  %v783_v40 = vld [vmem:[#allocation8 + $0x40] sm:$0xff]   ;;  %v91_v52 = vshrl.u32 %v90_v51, 7 }
  0x57   :  { %v784_v41 = vld [vmem:[#allocation8] sm:$0xff]   ;;  %v785_v42 = vld [vmem:[#allocation8 + $0x48] sm:$0xff]   ;;  %697 = vmatprep.subr.bf16.mxu0 %v783_v40  ;;  %v787_v44 = vld [vmem:[#allocation8 + $0x50] sm:$0xff]   ;;  %s930_s8 = smov [#allocation10]  }
  0x58   :  { %698 = vmatpush3.bf16.msra.mxu0 %v784_v41  ;;  %v786_v43 = vld [vmem:[#allocation8 + $0x8] sm:$0xff]   ;;  %v788_v45 = vld [vmem:[#allocation8 + $0x10] sm:$0xff]   ;;  %v789_v46 = vld [vmem:[#allocation8 + $0x58] sm:$0xff]   ;;  %v92_v53 = vsub.s32 0, %v91_v52  ;;  %v96_v55 = vsub.s32 1, %v91_v52  ;;  %s627_s9 = sshll.u32 %s930_s8, 4  ;;  %s628_s9 = int_to_ptr.vmem [resolvable:$true] %s627_s9 }
  0x59   :  { %391 = vmatpush1.bf16.msra.mxu1 %v746_v15  ;;  %699 = vmatprep.subr.bf16.mxu0 %v785_v42  ;;  %v790_v47 = vld [vmem:[#allocation8 + $0x18] sm:$0xff]   ;;  %v791_v48 = vld [vmem:[#allocation8 + $0x60] sm:$0xff]   ;;  %v793_v50 = vld [vmem:[#allocation8 + $0x68] sm:$0xff]   ;;  %p896_p5 = scmp.lt.s32.totalorder %s628_s9, %s628_s9 }
  0x5a   :  { %392 = vmatprep.subr.bf16.mxu1 %v747_v16  ;;  %v792_v49 = vld [vmem:[#allocation8 + $0x20] sm:$0xff]   ;;  %v794_v8 = vld [vmem:[#allocation8 + $0x28] sm:$0xff]   ;;  %v795_v9 = vld [vmem:[#allocation8 + $0x70] sm:$0xff]  }
  0x5b   :  { %v88_v54 = vld [vmem:[%s1064_s2] sm:$0x3]  ;;  %v796_v10 = vld [vmem:[#allocation8 + $0x30] sm:$0xff]   ;;  %v797_v11 = vld [vmem:[#allocation8 + $0x78] sm:$0xff]  }
  0x5c   :  { %700 = vmatpush3.bf16.msra.mxu0 %v786_v43  ;;  %v93_v56 = vrot.slane %v88_v54, %v92_v53  ;;  %v97_v57 = vrot.slane %v88_v54, %v96_v55  ;;  %v798_v12 = vld [vmem:[#allocation8 + $0x38] sm:$0xff]   ;;  %v212_v13 = vld [vmem:[%s1066_s4] sm:$0x3] }
  0x5d   :  { %393 = vmatpush1.bf16.msra.mxu1 %v749_v17  ;;  %701 = vmatprep.subr.bf16.mxu0 %v787_v44  ;;  %v217_v14 = vrot.slane %v212_v13, %v92_v53  ;;  %v221_v15 = vrot.slane %v212_v13, %v96_v55 }
  0x5e   :  { %394 = vmatprep.subr.bf16.mxu1 %v750_v18 }
  0x60   :  { %702 = vmatpush3.bf16.msra.mxu0 %v788_v45 }
  0x61   :  { %395 = vmatpush1.bf16.msra.mxu1 %v752_v19  ;;  %703 = vmatprep.subr.bf16.mxu0 %v789_v46 }
  0x62   :  { %396 = vmatprep.subr.bf16.mxu1 %v753_v20 }
  0x64   :  { %704 = vmatpush3.bf16.msra.mxu0 %v790_v47 }
  0x65   :  { %397 = vmatpush1.bf16.msra.mxu1 %v755_v21  ;;  %705 = vmatprep.subr.bf16.mxu0 %v791_v48 }
  0x66   :  { %398 = vmatprep.subr.bf16.mxu1 %v756_v22 }
  0x68   :  { %706 = vmatpush3.bf16.msra.mxu0 %v792_v49 }
  0x69   :  { %399 = vmatpush1.bf16.msra.mxu1 %v758_v23  ;;  %707 = vmatprep.subr.bf16.mxu0 %v793_v50 }
  0x6a   :  { %400 = vmatprep.subr.bf16.mxu1 %v759_v24 }
  0x6c   :  { %708 = vmatpush3.bf16.msra.mxu0 %v794_v8 }
  0x6d   :  { %401 = vmatpush1.bf16.msra.mxu1 %v761_v25  ;;  %709 = vmatprep.subr.bf16.mxu0 %v795_v9 }
  0x6e   :  { %402 = vmatprep.subr.bf16.mxu1 %v762_v26 }
  0x70   :  { %710 = vmatpush3.bf16.msra.mxu0 %v796_v10 }
  0x71   :  { %403 = vmatpush1.bf16.msra.mxu1 %v764_v27  ;;  %711 = vmatprep.subr.bf16.mxu0 %v797_v11 }
  0x72   :  { %404 = vmatprep.subr.bf16.mxu1 %v765_v28 }
  0x74   :  { %712 = vmatpush3.bf16.msra.mxu0 %v798_v12 }
  0x75   :  { %405 = vmatpush1.bf16.msra.mxu1 %v767_v29 }
  0x76   :  { %406 = vmatprep.subr.bf16.mxu1 %v768_v30 }
  0x79   :  { %407 = vmatpush1.bf16.msra.mxu1 %v770_v31  ;;  %v680_v31 = vld [vmem:[%s1068_s6] ss:$0 sm:$0xff]  ;;  %s891_s6 = scalar_lea.vmem %s628_s9, 256 }
  0x7a   :  { %408 = vmatprep.subr.bf16.mxu1 %v771_v32  ;;  %p892_p4 = scmp.ne.s32.totalorder %s628_s9, %s891_s6  ;;  %p897_p6 = scmp.lt.s32.totalorder %s891_s6, %s891_s6 }
  0x7c   :  { %p898_p7 = por %p897_p6, %p896_p5 }
  0x7d   :  { %409 = vmatpush1.bf16.msra.mxu1 %v773_v33 }
  0x7e   :  { %410 = vmatprep.subr.bf16.mxu1 %v774_v34  ;;  %p899_p8 = pnand %p898_p7, %p892_p4 }
  0x81   :  { %411 = vmatpush1.bf16.msra.mxu1 %v776_v35 }
  0x82   :  { %412 = vmatprep.subr.bf16.mxu1 %v777_v36 }
  0x85   :  { %413 = vmatpush1.bf16.msra.mxu1 %v779_v37 }
  0x86   :  { %414 = vmatprep.subr.bf16.mxu1 %v780_v38 }
  0x89   :  { %415 = vmatpush1.bf16.msra.mxu1 %v782_v39  ;;  %v616_v39 = vand.u32 127, %v90_v51 }
  0x8b   :  { %vm617_vm2 = vcmp.lt.s32.totalorder %v616_v39, 4 }
 0x126   :  { %v165_v58 = vpop.f32.mrb[0].mxu0 }
 0x127   :  { %v166_v59 = vadd.f32 %v165_v58, %v93_v56  ;;  %v167_v60 = vpop.f32.mrb[1].mxu0 }
 0x128   :  { %v168_v61 = vadd.f32 %v167_v60, %v97_v57  ;;  %v169_v62 = vpop.f32.mrb[2].mxu0 }
 0x129   :  { %v170_v63 = vadd.f32 %v169_v62, %v93_v56  ;;  %v171_v0 = vpop.f32.mrb[3].mxu0  ;;  %v174_v2 = vmax.f32 %v166_v59, 0.0 }
 0x12a   :  { %v172_v1 = vadd.f32 %v171_v0, %v97_v57  ;;  %v175_v4 = vmax.f32 %v168_v61, 0.0 }
 0x12b   :  { %v176_v3 = vmax.f32 %v170_v63, 0.0 }
 0x12c   :  { %v177_v5 = vmax.f32 %v172_v1, 0.0 }
 0x12d   :  { %v178_v6 = vpack.c.bf16 %v176_v3, %v174_v2 }
 0x12e   :  { %v179_v7 = vpack.c.bf16 %v177_v5, %v175_v4 }
 0x130   :  { %416 = vmatprep.mubr.bf16.mxu1 %v179_v7 }
 0x131   :  { %417 = vmatmul.mubr.bf16.vlgmr.msra.gmra.mrb[0].mxu1 %v178_v6 }
 0x204   :  { %v418_v16 = vpop.f32.mrb[0].mxu1 }
 0x205   :  { %v419_v17 = vadd.f32 %v418_v16, %v217_v14  ;;  %v420_v18 = vpop.f32.mrb[1].mxu1 }
 0x206   :  { %v421_v19 = vadd.f32 %v420_v18, %v221_v15  ;;  %v422_v20 = vpop.f32.mrb[2].mxu1 }
 0x207   :  { %v423_v21 = vadd.f32 %v422_v20, %v217_v14  ;;  %v424_v22 = vpop.f32.mrb[3].mxu1  ;;  %v427_v24 = vmax.f32 %v419_v17, 0.0 }
 0x208   :  { %v425_v23 = vadd.f32 %v424_v22, %v221_v15  ;;  %v428_v26 = vmax.f32 %v421_v19, 0.0 }
 0x209   :  { %v429_v25 = vmax.f32 %v423_v21, 0.0 }
 0x20a   :  { %v430_v27 = vmax.f32 %v425_v23, 0.0 }
 0x20b   :  { %v431_v28 = vpack.c.bf16 %v429_v25, %v427_v24 }
 0x20c   :  { %v432_v29 = vpack.c.bf16 %v430_v27, %v428_v26 }
 0x20e   :  { %600 = vmatprep.mubr.bf16.mxu0 %v432_v29 }
 0x20f   :  { %601 = vmatmul.mubr.bf16.vlgmr.msra.gmra.mrb[4].mxu0 %v431_v28 }
 0x2e2   :  { %v713_v30 = vpop.f32.mrb[4].mxu0 }
 0x2e3   :  { %v714_v32 = vpop.f32.mrb[5].mxu0 }
 0x2e4   :  { %v715_v33 = vadd.f32 %v714_v32, %v713_v30  ;;  %v716_v34 = vpop.f32.mrb[6].mxu0 }
 0x2e5   :  { %v717_v35 = vpop.f32.mrb[7].mxu0 }
 0x2e6   :  { %v603_v36 = vadd.f32 %v715_v33, %v680_v31  ;;  %v718_v37 = vadd.f32 %v717_v35, %v716_v34 }
 0x2e8   :  { %799 = vtanh.f32 %v603_v36  ;;  %v606_v38 = vadd.f32 %v718_v37, %v680_v31 }
 0x2ea   :  { %801 = vtanh.f32 %v606_v38 }
 0x2f2   :  { %v800_v40 = vpop.eup %799 }
 0x2f3   :  { %v611_v41 = vmul.f32 3.5, %v800_v40 }
 0x2f4   :  { %v802_v42 = vpop.eup %801 }
 0x2f5   :  { %v613_v43 = vadd.f32 -1.5, %v611_v41  ;;  %v612_v44 = vmul.f32 3.5, %v802_v42 }
 0x2f7   :  { %v614_v45 = vadd.f32 -1.5, %v612_v44  ;;  %v618_v46 = vsel %vm617_vm2, %v603_v36, %v613_v43 }
 0x2f8   :  { %620 = vst [vmem:[#allocation10] sm:$0xff] %v618_v46 }
 0x2f9   :  { %v619_v47 = vsel %vm617_vm2, %v606_v38, %v614_v45 }
 0x2fa   :  { %621 = vst [vmem:[#allocation10 + $0x8] sm:$0xff] %v619_v47 }
 0x2fb   :  { %902 = shalt.err (!%p899_p8)
}
 0x2fc   :  { %s903_s14 = scalar_lea.hbm %s1069_s7, 256 }
 0x2fd   :  { %p904_p9 = scmp.ne.s32.totalorder %s1069_s7, %s903_s14  ;;  %p907_p10 = scmp.lt.u32.totalorder %s903_s14, %s1069_s7 }
 0x2ff   :  { %p909_p11 = pnand %p907_p10, %p904_p9 }
 0x301   :  { %912 = shalt.err (!%p909_p11)
}
 0x302   :  { %633 = dma.vmem_to_hbm [thread:$0]  %s628_s9, 256, %s1069_s7, [#allocation4], %s922_s11, %s922_s11, %s923_s12  }
 0x303   :  { %919 = dma.done.wait [#allocation4], 256  }
 0x304   :  { %920 = vsyncadd [#allocation4], 4294967040 }
 0x305   :  { %637 = vsyncpa [#allocation3], 1 }
 0x306   :  { %638 = vsyncpa [#allocation6], 1 }
 0x307   :  { %639 = vsyncpa [#allocation9], 1 }
 0x308   :  { %640 = vsyncpa [#allocation4], 1 }

</bundles_post_ra>
